<compile_context>
chip_gen: v7x
topology: tpu7x:2x2x1
jax: 0.10.0
libtpu: 0.0.40
codegen_flags: <defaults>
</compile_context>

<pallas_src>
import functools

import jax
import jax.numpy as jnp
from jax.experimental import pallas as pl
from jax.experimental.pallas import tpu as pltpu

EPS = 1e-6
_MiB = 1024 * 1024


def _cdiv(a, b):
    return -(-a // b)


# --------------------------------------------------------------------------- #
# Kernel bodies
# --------------------------------------------------------------------------- #
def _matmul_ln_epilogue(xp, w_aug, params, o_ref, n_out):
    """Shared conv-as-matmul + channels-first LayerNorm epilogue.

    xp:     (K, TS)   channel-major patches for this tile (K = C*p*p)
    w_aug:  (N+1, K)  conv weight rows + one extra row = mean_n(W[n,:])
    params: (N+1, 4)  f32 [bias_aug | ln_gamma | ln_beta | pad]
    o_ref:  (1, N, TS)
    """
    y = jnp.dot(w_aug, xp, preferred_element_type=jnp.float32)      # (N+1, TS) f32
    y = y + params[:, 0:1]                                          # conv bias (+ mean(b) row)
    mean = y[n_out:, :]                                             # LN mean, free via extra MXU row
    yc = y[:n_out, :] - mean
    var = jnp.mean(yc * yc, axis=0, keepdims=True)                  # biased var (timm LayerNorm2d)
    yn = yc * jax.lax.rsqrt(var + EPS)
    yn = yn * params[:n_out, 1:2] + params[:n_out, 2:3]
    o_ref[0] = yn.astype(o_ref.dtype)


def _stem_kernel_fused(x_ref, w_ref, p_ref, o_ref, *, C, Th, P, Wo, n_out):
    """Fused path: x block is raw NCHW rows, patchify happens in VMEM."""
    xb = x_ref[0]                                   # (C, Th, P*Wo*P)
    xb = xb.reshape(C, Th, P, Wo, P)                # axes (c, t, i, ow, j)
    xb = jnp.transpose(xb, (0, 2, 4, 1, 3))         # axes (c, i, j, t, ow)
    xp = xb.reshape(C * P * P, Th * Wo)             # K-order matches conv_w.reshape(N, K)
    _matmul_ln_epilogue(xp, w_ref[...], p_ref[...], o_ref, n_out)


def _stem_kernel_pre(x_ref, w_ref, p_ref, o_ref, *, n_out):
    """Fallback path: x was patchified to (B, K, S) in HBM by the wrapper."""
    _matmul_ln_epilogue(x_ref[0], w_ref[...], p_ref[...], o_ref, n_out)


# --------------------------------------------------------------------------- #
# Sizing helpers (generation-aware)
# --------------------------------------------------------------------------- #
def _vmem_capacity_bytes():
    try:
        info = pltpu.get_tpu_info()
        cap = getattr(info, "vmem_capacity_bytes", None)
        if cap:
            return int(cap)
    except Exception:
        pass
    return 64 * _MiB  # conservative default (v7x per-TensorCore VMEM)


def _choose_row_tile(B, Ho, Wo, K, N, esize):
    """Pick the output-row tile Th and a safe vmem_limit_bytes."""
    phys = _vmem_capacity_bytes()
    # Per-tile budget: big tiles amortize the ~0.35us/step overhead and keep
    # DMAs near the HBM roofline, but leave headroom for double buffers and
    # compiler scratch (v7x only has 64 MiB per TensorCore).
    budget = 12 * _MiB if phys <= 64 * _MiB else 16 * _MiB
    # Bytes per spatial output column:
    #   x block (K elems, double buffered) + regroup temporaries  ~ 4*K*esize
    #   out block (N elems, double buffered)                      ~ 2*N*esize
    #   f32 LN temporaries (y_aug, centered, mean/var rows)       ~ (2N+3)*4
    per_col = 4 * K * esize + 2 * N * esize + (2 * N + 3) * 4
    th_cap = max(1, (budget // per_col) // max(Wo, 1))

    # Mosaic layout rule for tiled dims: second-minor % 8 == 0 (x block row dim)
    # and minor % 128 == 0 (output Th*Wo), unless the block spans the full dim.
    cand = sorted({t for t in range(8, Ho, 8) if (t * Wo) % 128 == 0} | {Ho})
    th = cand[0]
    for t in cand:
        if t <= th_cap:
            th = t
    # Megacore / multi-core: aim for >=4 grid programs as long as the output
    # tile stays >= 512 lanes (measured ~85% of HBM roofline at 512+).
    while B * _cdiv(Ho, th) < 4:
        smaller = [t for t in cand if t < th and t * Wo >= 512]
        if not smaller:
            break
        th = smaller[-1]

    tile_bytes = per_col * th * Wo + 2 * (N + 1) * (K * esize + 16)
    vmem_limit = int(min(max(tile_bytes * 3 // 2, 32 * _MiB), phys * 3 // 4))
    return th, vmem_limit


def _prepare_weights(conv_w, conv_b, ln_w, ln_b, compute_dtype):
    n_out = conv_w.shape[0]
    K = conv_w.shape[1] * conv_w.shape[2] * conv_w.shape[3]
    w2 = conv_w.reshape(n_out, K).astype(jnp.float32)
    # Extra row = channel-average of the conv rows: the matmul then produces the
    # LayerNorm mean directly (one fewer reduction pass over the f32 buffer).
    w_aug = jnp.concatenate([w2, jnp.mean(w2, axis=0, keepdims=True)], axis=0)
    w_aug = w_aug.astype(compute_dtype)

    b = conv_b.astype(jnp.float32).reshape(n_out)
    b_aug = jnp.concatenate([b, jnp.mean(b, keepdims=True)], axis=0)         # (N+1,)
    zero = jnp.zeros((1,), jnp.float32)
    gamma = jnp.concatenate([ln_w.astype(jnp.float32).reshape(n_out), zero], 0)
    beta = jnp.concatenate([ln_b.astype(jnp.float32).reshape(n_out), zero], 0)
    params = jnp.stack([b_aug, gamma, beta, jnp.zeros_like(b_aug)], axis=1)   # (N+1, 4)
    return w_aug, params


# --------------------------------------------------------------------------- #
# pallas_call builders
# --------------------------------------------------------------------------- #
def _call_fused(x5, w_aug, params, *, n_out, C, P, Ho, Wo, Th, vmem_limit, out_dtype):
    B = x5.shape[0]
    K = C * P * P
    S = Ho * Wo
    TS = Th * Wo
    kernel = functools.partial(_stem_kernel_fused, C=C, Th=Th, P=P, Wo=Wo, n_out=n_out)
    return pl.pallas_call(
        kernel,
        out_shape=jax.ShapeDtypeStruct((B, n_out, S), out_dtype),
        grid_spec=pltpu.PrefetchScalarGridSpec(
            num_scalar_prefetch=0,
            grid=(B, _cdiv(Ho, Th)),
            in_specs=[
                # raw NCHW rows (B, C, Ho, P*W): one tile of Th output rows
                pl.BlockSpec((1, C, Th, P * Wo * P), lambda b, h: (b, 0, h, 0)),
                pl.BlockSpec((n_out + 1, K), lambda b, h: (0, 0)),   # conv weight (+ mean row)
                pl.BlockSpec((n_out + 1, 4), lambda b, h: (0, 0)),   # packed bias/gamma/beta
            ],
            out_specs=pl.BlockSpec((1, n_out, TS), lambda b, h: (b, 0, h)),
        ),
        compiler_params=pltpu.CompilerParams(
            dimension_semantics=("parallel", "parallel"),
            vmem_limit_bytes=vmem_limit),
    )(x5, w_aug, params)


def _call_pre(x_km, w_aug, params, *, n_out, K, S, TS, vmem_limit, out_dtype):
    B = x_km.shape[0]
    kernel = functools.partial(_stem_kernel_pre, n_out=n_out)
    return pl.pallas_call(
        kernel,
        out_shape=jax.ShapeDtypeStruct((B, n_out, S), out_dtype),
        grid_spec=pltpu.PrefetchScalarGridSpec(
            num_scalar_prefetch=0,
            grid=(B, _cdiv(S, TS)),
            in_specs=[
                pl.BlockSpec((1, K, TS), lambda b, s: (b, 0, s)),
                pl.BlockSpec((n_out + 1, K), lambda b, s: (0, 0)),
                pl.BlockSpec((n_out + 1, 4), lambda b, s: (0, 0)),
            ],
            out_specs=pl.BlockSpec((1, n_out, TS), lambda b, s: (b, 0, s)),
        ),
        compiler_params=pltpu.CompilerParams(
            dimension_semantics=("parallel", "parallel"),
            vmem_limit_bytes=vmem_limit),
    )(x_km, w_aug, params)


# --------------------------------------------------------------------------- #
# Forward + fused-path probe
# --------------------------------------------------------------------------- #
def _forward(x, conv_w, conv_b, ln_w, ln_b, patch_size, force_fused=None):
    B, C, H, Wd = x.shape
    n_out = conv_w.shape[0]
    P = patch_size
    Ho, Wo = H // P, Wd // P
    S = Ho * Wo
    K = C * P * P
    x = x[:, :, :Ho * P, :Wo * P]  # strided conv drops any remainder rows/cols
    w_aug, params = _prepare_weights(conv_w, conv_b, ln_w, ln_b, x.dtype)
    esize = jnp.dtype(x.dtype).itemsize
    Th, vmem_limit = _choose_row_tile(B, Ho, Wo, K, n_out, esize)

    use_fused = force_fused if force_fused is not None else _fused_path_ok()
    if use_fused:
        # Free reshape (no data movement): (B, C, H, W) -> (B, C, Ho, P*W).
        # Patch extraction happens inside the kernel, in VMEM.
        x5 = x.reshape(B, C, Ho, P * Wo * P)
        out = _call_fused(x5, w_aug, params, n_out=n_out, C=C, P=P, Ho=Ho, Wo=Wo,
                          Th=Th, vmem_limit=vmem_limit, out_dtype=x.dtype)
    else:
        # Fallback: channel-major patchify in HBM (one extra read+write of x);
        # identical kernel from the matmul onward.
        x_km = (x.reshape(B, C, Ho, P, Wo, P)
                  .transpose(0, 1, 3, 5, 2, 4)
                  .reshape(B, K, S))
        out = _call_pre(x_km, w_aug, params, n_out=n_out, K=K, S=S, TS=Th * Wo,
                        vmem_limit=vmem_limit, out_dtype=x.dtype)
    # (B, N, S) -> (B, N, Ho, Wo): pure reshape, already NCHW.
    return out.reshape(B, n_out, Ho, Wo)


def _reference(x, conv_w, conv_b, ln_w, ln_b, p):
    """Pure-JAX reference (f32, highest precision) for correctness checks."""
    y = jax.lax.conv_general_dilated(
        x.astype(jnp.float32), conv_w.astype(jnp.float32),
        window_strides=(p, p), padding="VALID",
        dimension_numbers=("NCHW", "OIHW", "NCHW"),
        precision=jax.lax.Precision.HIGHEST)
    y = y + conv_b.reshape(1, -1, 1, 1).astype(jnp.float32)
    mean = jnp.mean(y, axis=1, keepdims=True)
    var = jnp.mean((y - mean) ** 2, axis=1, keepdims=True)
    y = (y - mean) * jax.lax.rsqrt(var + EPS)
    return y * ln_w.reshape(1, -1, 1, 1) + ln_b.reshape(1, -1, 1, 1)


_FUSED_OK = [None]


def _fused_path_ok():
    """Probe the fused (in-kernel patchify) path once: it relies on a rank-5
    VMEM relayout; if this Mosaic build cannot lower it (or lowers it wrong),
    fall back to the HBM-patchified layout."""
    if _FUSED_OK[0] is None:
        try:
            key = jax.random.PRNGKey(123)
            kx, kw, kb, kg, kbb = jax.random.split(key, 5)
            x = jax.random.normal(kx, (1, 2, 8, 8), jnp.float32)
            cw = 0.2 * jax.random.normal(kw, (8, 2, 2, 2), jnp.float32)
            cb = 0.1 * jax.random.normal(kb, (8,), jnp.float32)
            g = 1.0 + 0.1 * jax.random.normal(kg, (8,), jnp.float32)
            bb = 0.1 * jax.random.normal(kbb, (8,), jnp.float32)
            got = _forward(x, cw, cb, g, bb, 2, force_fused=True)
            jax.block_until_ready(got)
            want = _reference(x, cw, cb, g, bb, 2)
            _FUSED_OK[0] = bool(jnp.allclose(got, want, atol=1e-3, rtol=1e-3))
        except Exception:
            _FUSED_OK[0] = False
    return _FUSED_OK[0]


def stem_patch_forward(x, conv_w, conv_b, ln_w, ln_b, patch_size):
    """Stem(stem_type='patch'): patchify Conv2d + channels-first LayerNorm.

    x: (B, C, H, W) NCHW; conv_w: (out_ch, C, p, p); conv_b/ln_w/ln_b: (out_ch,).
    Returns (B, out_ch, H//p, W//p) in x.dtype.
    """
    return _forward(x, conv_w, conv_b, ln_w, ln_b, patch_size)


# TODO(synk): other stem_type branches ('s4nd', 's4nd_patch', 'new_s4nd_patch',
# 'depthwise_patch', 'new_patch', 'default') depend on the external S4 layer
# registry / utils.instantiate and are not reproducible here.


if __name__ == "__main__":
    key = jax.random.PRNGKey(0)
    B, Cin, H, W = 2, 3, 16, 16
    n_out, P = 64, 4

    k1, k2, k3, k4, k5, k6 = jax.random.split(key, 6)
    x = jax.random.normal(k1, (B, Cin, H, W), dtype=jnp.float32)
    conv_w = 0.1 * jax.random.normal(k2, (n_out, Cin, P, P), dtype=jnp.float32)
    conv_b = 0.1 * jax.random.normal(k3, (n_out,), dtype=jnp.float32)
    ln_w = 1.0 + 0.05 * jax.random.normal(k4, (n_out,), dtype=jnp.float32)
    ln_b = 0.05 * jax.random.normal(k5, (n_out,), dtype=jnp.float32)

    # Case 1: module-default small shape (whole image per grid step, 2 programs).
    y = jax.block_until_ready(stem_patch_forward(x, conv_w, conv_b, ln_w, ln_b, P))
    y_ref = _reference(x, conv_w, conv_b, ln_w, ln_b, P)
    assert y.shape == (B, n_out, H // P, W // P)
    assert jnp.allclose(y, y_ref, atol=1e-3, rtol=1e-3), "mismatch vs reference (case 1)"

    # Case 2: larger single image -> exercises row tiling and the multi-program
    # grid used for megacore sharding.
    x2 = jax.random.normal(k6, (1, Cin, 128, 128), dtype=jnp.float32)
    y2 = jax.block_until_ready(stem_patch_forward(x2, conv_w, conv_b, ln_w, ln_b, P))
    y2_ref = _reference(x2, conv_w, conv_b, ln_w, ln_b, P)
    assert y2.shape == (1, n_out, 32, 32)
    assert jnp.allclose(y2, y2_ref, atol=1e-3, rtol=1e-3), "mismatch vs reference (case 2)"

    print("KERNEL_OK")
</pallas_src>

<mosaic_0001>
module attributes {stable_mosaic.version = 11 : i64} {
  func.func @_stem_kernel_fused(%arg0: i32, %arg1: i32, %arg2: memref<1x2x4x16xf32, #tpu.memory_space<vmem>>, %arg3: memref<9x8xf32, #tpu.memory_space<vmem>>, %arg4: memref<9x4xf32, #tpu.memory_space<vmem>>, %arg5: memref<1x8x16xf32, #tpu.memory_space<vmem>>) attributes {dimension_semantics = [#tpu.dimension_semantics<parallel>, #tpu.dimension_semantics<parallel>], iteration_bounds = array<i64: 1, 1>, scalar_prefetch = 0 : i64, scratch_operands = 0 : i64, tpu.core_type = #tpu.core_type<tc>, window_params = [{transform_indices = @transform_0, window_bounds = array<i64: 1, 2, 4, 16>}, {pipeline_mode = #tpu.pipeline_mode<synchronous>, transform_indices = @transform_1, window_bounds = array<i64: 9, 8>}, {pipeline_mode = #tpu.pipeline_mode<synchronous>, transform_indices = @transform_2, window_bounds = array<i64: 9, 4>}, {transform_indices = @transform_3, window_bounds = array<i64: 1, 8, 16>}]} {
    %c0 = arith.constant 0 : index
    %c0_0 = arith.constant 0 : index
    %c0_1 = arith.constant 0 : index
    %c0_2 = arith.constant 0 : index
    %0 = vector.load %arg2[%c0, %c0_0, %c0_1, %c0_2] : memref<1x2x4x16xf32, #tpu.memory_space<vmem>>, vector<1x2x4x16xf32>
    %1 = vector.shape_cast %0 : vector<1x2x4x16xf32> to vector<2x4x16xf32>
    %2 = vector.shape_cast %1 : vector<2x4x16xf32> to vector<2x4x2x4x2xf32>
    %3 = tpu.transpose %2, [0, 2, 4, 1, 3] : vector<2x4x2x4x2xf32> -> vector<2x2x2x4x4xf32>
    %4 = vector.shape_cast %3 : vector<2x2x2x4x4xf32> to vector<8x16xf32>
    %c0_3 = arith.constant 0 : index
    %c0_4 = arith.constant 0 : index
    %5 = vector.load %arg3[%c0_3, %c0_4] : memref<9x8xf32, #tpu.memory_space<vmem>>, vector<9x8xf32>
    %c0_5 = arith.constant 0 : index
    %c0_6 = arith.constant 0 : index
    %6 = vector.load %arg4[%c0_5, %c0_6] : memref<9x4xf32, #tpu.memory_space<vmem>>, vector<9x4xf32>
    %cst = arith.constant dense<0.000000e+00> : vector<9x16xf32>
    %7 = tpu.matmul %5, %4, %cst {dimension_numbers = #tpu.dot_dimension_numbers<[1], [0], [0], [1], [0, 0, 1, 1], [], []>} : vector<9x8xf32>, vector<8x16xf32>, vector<9x16xf32> -> vector<9x16xf32>
    %8 = vector.extract_strided_slice %6 {offsets = [0, 0], sizes = [9, 1], strides = [1, 1]} : vector<9x4xf32> to vector<9x1xf32>
    %9 = vector.broadcast %8 : vector<9x1xf32> to vector<9x16xf32>
    %10 = arith.addf %7, %9 : vector<9x16xf32>
    %11 = vector.extract_strided_slice %10 {offsets = [8, 0], sizes = [1, 16], strides = [1, 1]} : vector<9x16xf32> to vector<1x16xf32>
    %12 = vector.extract_strided_slice %10 {offsets = [0, 0], sizes = [8, 16], strides = [1, 1]} : vector<9x16xf32> to vector<8x16xf32>
    %13 = vector.broadcast %11 : vector<1x16xf32> to vector<8x16xf32>
    %14 = arith.subf %12, %13 : vector<8x16xf32>
    %15 = arith.mulf %14, %14 : vector<8x16xf32>
    %cst_7 = arith.constant dense<0.000000e+00> : vector<16xf32>
    %16 = vector.multi_reduction <add>, %15, %cst_7 [0] : vector<8x16xf32> to vector<16xf32>
    %17 = vector.shape_cast %16 : vector<16xf32> to vector<1x16xf32>
    %cst_8 = arith.constant 8.000000e+00 : f32
    %18 = vector.broadcast %cst_8 : f32 to vector<1x16xf32>
    %19 = arith.divf %17, %18 : vector<1x16xf32>
    %cst_9 = arith.constant 9.99999997E-7 : f32
    %20 = vector.broadcast %cst_9 : f32 to vector<1x16xf32>
    %21 = arith.addf %19, %20 : vector<1x16xf32>
    %22 = math.rsqrt %21 : vector<1x16xf32>
    %23 = vector.broadcast %22 : vector<1x16xf32> to vector<8x16xf32>
    %24 = arith.mulf %14, %23 : vector<8x16xf32>
    %25 = vector.extract_strided_slice %6 {offsets = [0, 1], sizes = [8, 1], strides = [1, 1]} : vector<9x4xf32> to vector<8x1xf32>
    %26 = vector.broadcast %25 : vector<8x1xf32> to vector<8x16xf32>
    %27 = arith.mulf %24, %26 : vector<8x16xf32>
    %28 = vector.extract_strided_slice %6 {offsets = [0, 2], sizes = [8, 1], strides = [1, 1]} : vector<9x4xf32> to vector<8x1xf32>
    %29 = vector.broadcast %28 : vector<8x1xf32> to vector<8x16xf32>
    %30 = arith.addf %27, %29 : vector<8x16xf32>
    %c0_10 = arith.constant 0 : index
    %c0_11 = arith.constant 0 : index
    %c0_12 = arith.constant 0 : index
    %31 = vector.load %arg5[%c0_10, %c0_11, %c0_12] : memref<1x8x16xf32, #tpu.memory_space<vmem>>, vector<1x8x16xf32>
    %32 = vector.shape_cast %31 : vector<1x8x16xf32> to vector<8x16xf32>
    %33 = vector.shape_cast %30 : vector<8x16xf32> to vector<1x8x16xf32>
    tpu.vector_store %arg5[%c0_10, %c0_11, %c0_12], %33 {strides = array<i32>} : memref<1x8x16xf32, #tpu.memory_space<vmem>>, vector<1x8x16xf32>,
    return
  }
  func.func @transform_0(%arg0: i32, %arg1: i32) -> (i32, i32, i32, i32) {
    %c0_i32 = arith.constant 0 : i32
    %c0_i32_0 = arith.constant 0 : i32
    %c0_i32_1 = arith.constant 0 : i32
    return %arg0, %c0_i32, %arg1, %c0_i32_0 : i32, i32, i32, i32
  }
  func.func @transform_1(%arg0: i32, %arg1: i32) -> (i32, i32) {
    %c0_i32 = arith.constant 0 : i32
    %c0_i32_0 = arith.constant 0 : i32
    %c0_i32_1 = arith.constant 0 : i32
    return %c0_i32, %c0_i32_0 : i32, i32
  }
  func.func @transform_2(%arg0: i32, %arg1: i32) -> (i32, i32) {
    %c0_i32 = arith.constant 0 : i32
    %c0_i32_0 = arith.constant 0 : i32
    %c0_i32_1 = arith.constant 0 : i32
    return %c0_i32, %c0_i32_0 : i32, i32
  }
  func.func @transform_3(%arg0: i32, %arg1: i32) -> (i32, i32, i32) {
    %c0_i32 = arith.constant 0 : i32
    %c0_i32_0 = arith.constant 0 : i32
    return %arg0, %c0_i32, %arg1 : i32, i32, i32
  }
}

module attributes {stable_mosaic.version = 11 : i64} {
  func.func @_stem_kernel_pre(%arg0: i32, %arg1: i32, %arg2: memref<1x48x16xf32, #tpu.memory_space<vmem>>, %arg3: memref<65x48xf32, #tpu.memory_space<vmem>>, %arg4: memref<65x4xf32, #tpu.memory_space<vmem>>, %arg5: memref<1x64x16xf32, #tpu.memory_space<vmem>>) attributes {dimension_semantics = [#tpu.dimension_semantics<parallel>, #tpu.dimension_semantics<parallel>], iteration_bounds = array<i64: 2, 1>, scalar_prefetch = 0 : i64, scratch_operands = 0 : i64, tpu.core_type = #tpu.core_type<tc>, window_params = [{transform_indices = @transform_0, window_bounds = array<i64: 1, 48, 16>}, {pipeline_mode = #tpu.pipeline_mode<synchronous>, transform_indices = @transform_1, window_bounds = array<i64: 65, 48>}, {pipeline_mode = #tpu.pipeline_mode<synchronous>, transform_indices = @transform_2, window_bounds = array<i64: 65, 4>}, {transform_indices = @transform_3, window_bounds = array<i64: 1, 64, 16>}]} {
    %c0 = arith.constant 0 : index
    %c0_0 = arith.constant 0 : index
    %c0_1 = arith.constant 0 : index
    %0 = vector.load %arg2[%c0, %c0_0, %c0_1] : memref<1x48x16xf32, #tpu.memory_space<vmem>>, vector<1x48x16xf32>
    %1 = vector.shape_cast %0 : vector<1x48x16xf32> to vector<48x16xf32>
    %c0_2 = arith.constant 0 : index
    %c0_3 = arith.constant 0 : index
    %2 = vector.load %arg3[%c0_2, %c0_3] : memref<65x48xf32, #tpu.memory_space<vmem>>, vector<65x48xf32>
    %c0_4 = arith.constant 0 : index
    %c0_5 = arith.constant 0 : index
    %3 = vector.load %arg4[%c0_4, %c0_5] : memref<65x4xf32, #tpu.memory_space<vmem>>, vector<65x4xf32>
    %cst = arith.constant dense<0.000000e+00> : vector<65x16xf32>
    %4 = tpu.matmul %2, %1, %cst {dimension_numbers = #tpu.dot_dimension_numbers<[1], [0], [0], [1], [0, 0, 1, 1], [], []>} : vector<65x48xf32>, vector<48x16xf32>, vector<65x16xf32> -> vector<65x16xf32>
    %5 = vector.extract_strided_slice %3 {offsets = [0, 0], sizes = [65, 1], strides = [1, 1]} : vector<65x4xf32> to vector<65x1xf32>
    %6 = vector.broadcast %5 : vector<65x1xf32> to vector<65x16xf32>
    %7 = arith.addf %4, %6 : vector<65x16xf32>
    %8 = vector.extract_strided_slice %7 {offsets = [64, 0], sizes = [1, 16], strides = [1, 1]} : vector<65x16xf32> to vector<1x16xf32>
    %9 = vector.extract_strided_slice %7 {offsets = [0, 0], sizes = [64, 16], strides = [1, 1]} : vector<65x16xf32> to vector<64x16xf32>
    %10 = vector.broadcast %8 : vector<1x16xf32> to vector<64x16xf32>
    %11 = arith.subf %9, %10 : vector<64x16xf32>
    %12 = arith.mulf %11, %11 : vector<64x16xf32>
    %cst_6 = arith.constant dense<0.000000e+00> : vector<16xf32>
    %13 = vector.multi_reduction <add>, %12, %cst_6 [0] : vector<64x16xf32> to vector<16xf32>
    %14 = vector.shape_cast %13 : vector<16xf32> to vector<1x16xf32>
    %cst_7 = arith.constant 6.400000e+01 : f32
    %15 = vector.broadcast %cst_7 : f32 to vector<1x16xf32>
    %16 = arith.divf %14, %15 : vector<1x16xf32>
    %cst_8 = arith.constant 9.99999997E-7 : f32
    %17 = vector.broadcast %cst_8 : f32 to vector<1x16xf32>
    %18 = arith.addf %16, %17 : vector<1x16xf32>
    %19 = math.rsqrt %18 : vector<1x16xf32>
    %20 = vector.broadcast %19 : vector<1x16xf32> to vector<64x16xf32>
    %21 = arith.mulf %11, %20 : vector<64x16xf32>
    %22 = vector.extract_strided_slice %3 {offsets = [0, 1], sizes = [64, 1], strides = [1, 1]} : vector<65x4xf32> to vector<64x1xf32>
    %23 = vector.broadcast %22 : vector<64x1xf32> to vector<64x16xf32>
    %24 = arith.mulf %21, %23 : vector<64x16xf32>
    %25 = vector.extract_strided_slice %3 {offsets = [0, 2], sizes = [64, 1], strides = [1, 1]} : vector<65x4xf32> to vector<64x1xf32>
    %26 = vector.broadcast %25 : vector<64x1xf32> to vector<64x16xf32>
    %27 = arith.addf %24, %26 : vector<64x16xf32>
    %c0_9 = arith.constant 0 : index
    %c0_10 = arith.constant 0 : index
    %c0_11 = arith.constant 0 : index
    %28 = vector.load %arg5[%c0_9, %c0_10, %c0_11] : memref<1x64x16xf32, #tpu.memory_space<vmem>>, vector<1x64x16xf32>
    %29 = vector.shape_cast %28 : vector<1x64x16xf32> to vector<64x16xf32>
    %30 = vector.shape_cast %27 : vector<64x16xf32> to vector<1x64x16xf32>
    tpu.vector_store %arg5[%c0_9, %c0_10, %c0_11], %30 {strides = array<i32>} : memref<1x64x16xf32, #tpu.memory_space<vmem>>, vector<1x64x16xf32>,
    return
  }
  func.func @transform_0(%arg0: i32, %arg1: i32) -> (i32, i32, i32) {
    %c0_i32 = arith.constant 0 : i32
    %c0_i32_0 = arith.constant 0 : i32
    return %arg0, %c0_i32, %arg1 : i32, i32, i32
  }
  func.func @transform_1(%arg0: i32, %arg1: i32) -> (i32, i32) {
    %c0_i32 = arith.constant 0 : i32
    %c0_i32_0 = arith.constant 0 : i32
    %c0_i32_1 = arith.constant 0 : i32
    return %c0_i32, %c0_i32_0 : i32, i32
  }
  func.func @transform_2(%arg0: i32, %arg1: i32) -> (i32, i32) {
    %c0_i32 = arith.constant 0 : i32
    %c0_i32_0 = arith.constant 0 : i32
    %c0_i32_1 = arith.constant 0 : i32
    return %c0_i32, %c0_i32_0 : i32, i32
  }
  func.func @transform_3(%arg0: i32, %arg1: i32) -> (i32, i32, i32) {
    %c0_i32 = arith.constant 0 : i32
    %c0_i32_0 = arith.constant 0 : i32
    return %arg0, %c0_i32, %arg1 : i32, i32, i32
  }
}

</mosaic_0001>

<bundles_post_ra>
// kernel: tpu_custom_call.1
= control target key start
LH: loop header
LB: loop body
LE: loop exit
PB: predicated region body
PF: predicated region fallthrough
CT: control target
= control target key end

     0   :  { %s812_s12 = smov 0   ;;  %s814_s13 = smov 0   ;;  %s971_s0 = inlined_call_operand.vmem [shape: f32[2,48,16], index: 0, kind: input, shape index: {}]   ;;  %s972_s1 = inlined_call_operand.vmem [shape: f32[65,48], index: 1, kind: input, shape index: {}]   ;;  %s973_s2 = inlined_call_operand.vmem [shape: f32[65,4], index: 2, kind: input, shape index: {}]   ;;  %s974_s3 = inlined_call_operand.vmem [shape: f32[2,64,16], index: 3, kind: output, shape index: {}]  }
   0x1   :  { %s816_s14 = smov 0  }
   0x2 LB: > { %s25_s15 = sadd.s32 1, %s780_s13  ;;  %p638_p0 = scmp.ge.s32.totalorder %s784_s14, 1  ;;  %s784_s14 = sphi %s816_s14, %s13_s14   ;;  %s780_s13 = sphi %s814_s13, %s976_s13   ;;  %s776_s12 = sphi %s812_s12, %s975_s12  }
   0x3   : > { %p27_p1 = scmp.ge.s32.totalorder %s25_s15, 2  ;;  %p156_p2 = scmp.lt.s32.totalorder %s784_s14, 3 }
   0x5   : > { %s978_s15 = smov (%p27_p1, %s25_s15), 0  ;;  %p157_p3 = pnand %p638_p0, %p156_p2 }
   0x6   : > { %p186_p4 = scmp.lt.s32.totalorder (!%p157_p3), %s776_s12, 1  ;;  %v786_v0 = vmov (!%p157_p3), 0.0|0.0   ;;  %vm787_vm0 = vmmov (!%p157_p3), 0   ;;  %v788_v1 = vmov (!%p157_p3), 0.0   ;;  %v789_v2 = vmov (!%p157_p3), 0   ;;  %v843_v4 = vld [vmem:[%s973_s2 + $0x8] sm:$0xff] (!%p157_p3) }
   0x7   : > { %160 = sbr.rel (%p157_p3) target bundleno = 317 (0x13d), region = 32  ;;  %708 = vmatprep.subr.bf16.mxu0 (!%p157_p3), %v786_v0  ;;  %717 = vmatprep.subr.bf16.mxu1 (!%p157_p3), %v786_v0  ;;  %v225_v3 = vld [vmem:[%s973_s2 + $0x40] sm:$0x1] (!%p157_p3)  ;;  %v857_v6 = vld [vmem:[%s973_s2 + $0x10] sm:$0xff] (!%p157_p3)  ;;  %v864_v12 = vld [vmem:[%s973_s2 + $0x18] sm:$0xff] (!%p157_p3)  ;;  %vm271_vm1 = vcmask (!%p157_p3), 392192   ;;  %v409_v42 = vlaneseq (!%p157_p3) }
   0x8   : > { %681 = vmatprep.mubr.msk.f32.mxu0 (!%p157_p3), %vm787_vm0, %v788_v1  ;;  %696 = vmatprep.mubr.msk.f32.mxu1 (!%p157_p3), %vm787_vm0, %v788_v1  ;;  %v849_v5 = vld [vmem:[%s973_s2] sm:$0xff] (!%p157_p3)  ;;  %v222_v17 = vld [vmem:[%s973_s2 + $0x28] sm:$0xff] (!%p157_p3)  ;;  %v223_v19 = vld [vmem:[%s973_s2 + $0x30] sm:$0xff] (!%p157_p3)  ;;  %v790_v25 = vmov (!%p157_p3), 1   ;;  %v791_v31 = vmov (!%p157_p3), 2   ;;  %vm429_vm2 = vcmask (!%p157_p3), 130048  }
   0x9   : > { %754 = vset.pattern.permute.xlu0 (!%p157_p3), %v789_v2  ;;  %755 = vset.pattern.permute.xlu1 (!%p157_p3), %v789_v2  ;;  %v869_v14 = vld [vmem:[%s973_s2 + $0x20] sm:$0xff] (!%p157_p3)  ;;  %v224_v20 = vld [vmem:[%s973_s2 + $0x38] sm:$0xff] (!%p157_p3)  ;;  %v213_v22 = vld [vmem:[%s972_s1 + $0x28] sm:$0xff] (!%p157_p3)  ;;  %v410_v48 = vshrl.u32 (!%p157_p3), %v409_v42, 7 }
   0xa   : > { %268 = vperm.xlu0 (!%p157_p3), %754, %v225_v3   ;;  %233 = vperm.xlu1 (!%p157_p3), %755, %v843_v4   ;;  %v208_v21 = vld [vmem:[%s972_s1] sm:$0xff] (!%p157_p3)  ;;  %v209_v23 = vld [vmem:[%s972_s1 + $0x8] sm:$0xff] (!%p157_p3)  ;;  %v214_v24 = vld [vmem:[%s972_s1 + $0x30] sm:$0xff] (!%p157_p3) }
   0xb   : > { %v210_v26 = vld [vmem:[%s972_s1 + $0x10] sm:$0xff] (!%p157_p3)  ;;  %v215_v27 = vld [vmem:[%s972_s1 + $0x38] sm:$0xff] (!%p157_p3)  ;;  %v216_v29 = vld [vmem:[%s972_s1 + $0x40] sm:$0x1] (!%p157_p3)  ;;  %v411_v55 = vsub.s32 (!%p157_p3), 0, %v410_v48 }
   0xc   : > { %v211_v28 = vld [vmem:[%s972_s1 + $0x18] sm:$0xff] (!%p157_p3)  ;;  %v212_v30 = vld [vmem:[%s972_s1 + $0x20] sm:$0xff] (!%p157_p3) }
   0xe   : > { %s980_s12 = smov (!%p186_p4, %s776_s12), 1  ;;  %228 = vperm.xlu0 %754, %v849_v5   ;;  %238 = vperm.xlu1 %755, %v857_v6  }
   0xf   : > { %s723_s18 = smul.u32 48, %s980_s12  ;;  %s653_s6 = sshll.u32 %s980_s12, 6 }
  0x10   : > { %s201_s9 = scalar_lea.vmem %s974_s3, %s653_s6 }
  0x11   : > { %s193_s25 = scalar_lea.vmem %s971_s0, %s723_s18 }
  0x12   : > { %v202_v7 = vld [vmem:[%s193_s25] sm:$0xff]  ;;  %v203_v8 = vld [vmem:[%s193_s25 + $0x8] sm:$0xff]  ;;  %v204_v9 = vld [vmem:[%s193_s25 + $0x10] sm:$0xff]  ;;  %243 = vperm.xlu0 %754, %v864_v12   ;;  %248 = vperm.xlu1 %755, %v869_v14  }
  0x13   : > { %v709_v10 = vpack.c.bf16 %v203_v8, %v202_v7  ;;  %v205_v11 = vld [vmem:[%s193_s25 + $0x18] sm:$0xff]  ;;  %v206_v15 = vld [vmem:[%s193_s25 + $0x20] sm:$0xff]  ;;  %v207_v16 = vld [vmem:[%s193_s25 + $0x28] sm:$0xff] }
  0x14   : > { %v712_v13 = vpack.c.bf16 %v205_v11, %v204_v9  ;;  %v715_v18 = vpack.c.bf16 %v207_v16, %v206_v15 }
  0x15   : > { %710 = vmatpush3.bf16.msra.mxu0 %v709_v10  ;;  %720 = vmatpush3.bf16.msra.mxu1 %v709_v10 }
  0x16   : > { %711 = vmatprep.subr.bf16.mxu0 %v786_v0  ;;  %718 = vmatprep.subr.bf16.mxu1 %v786_v0 }
  0x17   : > { %253 = vperm.xlu0 %754, %v222_v17   ;;  %258 = vperm.xlu1 %755, %v223_v19  }
  0x19   : > { %713 = vmatpush3.bf16.msra.mxu0 %v712_v13  ;;  %721 = vmatpush3.bf16.msra.mxu1 %v712_v13 }
  0x1a   : > { %714 = vmatprep.subr.bf16.mxu0 %v786_v0  ;;  %719 = vmatprep.subr.bf16.mxu1 %v786_v0 }
  0x1b   : > { %263 = vperm.xlu0 %754, %v224_v20   ;;  %756 = vset.pattern.permute.xlu1 %v790_v25 }
  0x1c   : > { %464 = vperm.xlu1 %756, %v849_v5  }
  0x1d   : > { %716 = vmatpush3.bf16.msra.mxu0 %v715_v18  ;;  %722 = vmatpush3.bf16.msra.mxu1 %v715_v18 }
  0x1f   : > { %757 = vset.pattern.permute.xlu0 %v790_v25 }
  0x20   : > { %682 = vmatmul.mubr.msk.f32.vlgmr.msra.gmra.mrb[0].mxu0 %vm271_vm1, %v208_v21  ;;  %697 = vmatmul.mubr.msk.f32.vlgmr.msra.gmra.mrb[0].mxu1 %vm271_vm1, %v213_v22 }
  0x21   : > { %684 = vmatprep.mubr.msk.f32.mxu0 %vm787_vm0, %v788_v1  ;;  %699 = vmatprep.mubr.msk.f32.mxu1 %vm787_vm0, %v788_v1 }
  0x22   : > { %468 = vperm.xlu0 %757, %v843_v4   ;;  %472 = vperm.xlu1 %756, %v857_v6  }
  0x24   : > { %685 = vmatmul.mubr.msk.f32.gmra.mrb[2].mxu0 %vm271_vm1, %v209_v23  ;;  %700 = vmatmul.mubr.msk.f32.gmra.mrb[2].mxu1 %vm271_vm1, %v214_v24 }
  0x25   : > { %687 = vmatprep.mubr.msk.f32.mxu0 %vm787_vm0, %v788_v1  ;;  %702 = vmatprep.mubr.msk.f32.mxu1 %vm787_vm0, %v788_v1 }
  0x26   : > { %480 = vperm.xlu0 %757, %v869_v14   ;;  %476 = vperm.xlu1 %756, %v864_v12  }
  0x28   : > { %688 = vmatmul.mubr.msk.f32.gmra.mrb[4].mxu0 %vm271_vm1, %v210_v26  ;;  %703 = vmatmul.mubr.msk.f32.gmra.mrb[4].mxu1 %vm271_vm1, %v215_v27 }
  0x29   : > { %690 = vmatprep.mubr.msk.f32.mxu0 %vm787_vm0, %v788_v1  ;;  %705 = vmatprep.mubr.msk.f32.mxu1 %vm787_vm0, %v788_v1 }
  0x2a   : > { %488 = vperm.xlu0 %757, %v223_v19   ;;  %484 = vperm.xlu1 %756, %v222_v17  }
  0x2c   : > { %691 = vmatmul.mubr.msk.f32.gmra.mrb[6].mxu0 %vm271_vm1, %v211_v28  ;;  %706 = vmatmul.mubr.msk.f32.gmra.mrb[6].mxu1 %vm271_vm1, %v216_v29 }
  0x2d   : > { %693 = vmatprep.mubr.msk.f32.mxu0 %vm787_vm0, %v788_v1 }
  0x2e   : > { %758 = vset.pattern.permute.xlu0 %v791_v31  ;;  %492 = vperm.xlu1 %756, %v224_v20  }
  0x2f   : > { %504 = vperm.xlu0 %758, %v849_v5  }
  0x30   : > { %694 = vmatmul.mubr.msk.f32.gmra.mrb[8].mxu0 %vm271_vm1, %v212_v30 }
  0x32   : > { %759 = vset.pattern.permute.xlu1 %v791_v31 }
  0x33   : > { %516 = vperm.xlu0 %758, %v864_v12   ;;  %508 = vperm.xlu1 %759, %v843_v4  }
  0x37   : > { %524 = vperm.xlu0 %758, %v222_v17   ;;  %512 = vperm.xlu1 %759, %v857_v6  }
  0x3b   : > { %532 = vperm.xlu0 %758, %v224_v20   ;;  %520 = vperm.xlu1 %759, %v869_v14  }
  0x3f   : > { %528 = vperm.xlu1 %759, %v223_v19  }
  0x89   : > { %v269_v32 = vpop.permute.xlu0 %268  ;;  %v234_v33 = vpop.permute.xlu1 %233 }
  0x8d   : > { %v229_v34 = vpop.permute.xlu0 %228  ;;  %v239_v35 = vpop.permute.xlu1 %238 }
  0x91   : > { %v244_v36 = vpop.permute.xlu0 %243  ;;  %v249_v41 = vpop.permute.xlu1 %248 }
  0x96   : > { %v254_v47 = vpop.permute.xlu0 %253  ;;  %v259_v53 = vpop.permute.xlu1 %258 }
  0x9a   : > { %v264_v54 = vpop.permute.xlu0 %263 }
  0x9b   : > { %v465_v20 = vpop.permute.xlu1 %464 }
  0xf3   : > { %v390_v37 = vpop.f32.mrb[0].mxu1  ;;  %v365_v38 = vpop.f32.mrb[0].mxu0 }
  0xf4   : > { %v698_v39 = vpop.f32.mrb[1].mxu1  ;;  %v683_v40 = vpop.f32.mrb[1].mxu0  ;;  %v391_v61 = vadd.f32 %v390_v37, %v254_v47  ;;  %v366_v2 = vadd.f32 %v365_v38, %v229_v34 }
  0xf5   : > { %v469_v38 = vpop.permute.xlu0 %468 }
  0xf7   : > { %v395_v43 = vpop.f32.mrb[2].mxu1  ;;  %v370_v44 = vpop.f32.mrb[2].mxu0 }
  0xf8   : > { %v701_v45 = vpop.f32.mrb[3].mxu1  ;;  %v686_v46 = vpop.f32.mrb[3].mxu0  ;;  %v371_v62 = vadd.f32 %v370_v44, %v234_v33  ;;  %v396_v3 = vadd.f32 %v395_v43, %v259_v53 }
  0xf9   : > { %v481_v44 = vpop.permute.xlu0 %480 }
  0xfb   : > { %v400_v49 = vpop.f32.mrb[4].mxu1  ;;  %v375_v50 = vpop.f32.mrb[4].mxu0 }
  0xfc   : > { %v704_v51 = vpop.f32.mrb[5].mxu1  ;;  %v689_v52 = vpop.f32.mrb[5].mxu0  ;;  %v376_v63 = vadd.f32 %v375_v50, %v239_v35  ;;  %v401_v4 = vadd.f32 %v400_v49, %v264_v54 }
  0xfd   : > { %v489_v49 = vpop.permute.xlu0 %488 }
  0xff   : > { %v380_v56 = vpop.f32.mrb[6].mxu0  ;;  %v405_v57 = vpop.f32.mrb[6].mxu1 }
 0x100   : > { %v406_v58 = vadd.f32 %v405_v57, %v269_v32  ;;  %v707_v59 = vpop.f32.mrb[7].mxu1  ;;  %v692_v60 = vpop.f32.mrb[7].mxu0  ;;  %v381_v0 = vadd.f32 %v380_v56, %v244_v36 }
 0x101   : > { %v473_v32 = vpop.permute.xlu1 %472 }
 0x102   : > { %v412_v1 = vrot.slane %v406_v58, %v411_v55  ;;  %v505_v55 = vpop.permute.xlu0 %504 }
 0x103   : > { %v385_v5 = vpop.f32.mrb[8].mxu0 }
 0x104   : > { %v414_v6 = vsub.f32 %v371_v62, %v412_v1  ;;  %v415_v7 = vsub.f32 %v376_v63, %v412_v1  ;;  %v416_v8 = vsub.f32 %v381_v0, %v412_v1  ;;  %v418_v9 = vsub.f32 %v391_v61, %v412_v1  ;;  %v695_v10 = vpop.f32.mrb[9].mxu0 }
 0x105   : > { %v419_v11 = vsub.f32 %v396_v3, %v412_v1  ;;  %v420_v12 = vsub.f32 %v401_v4, %v412_v1  ;;  %v386_v13 = vadd.f32 %v385_v5, %v249_v41  ;;  %v413_v14 = vsub.f32 %v366_v2, %v412_v1  ;;  %v477_v41 = vpop.permute.xlu1 %476 }
 0x106   : > { %v422_v15 = vmul.f32 %v414_v6, %v414_v6  ;;  %v423_v18 = vmul.f32 %v415_v7, %v415_v7  ;;  %v424_v21 = vmul.f32 %v416_v8, %v416_v8  ;;  %v426_v27 = vmul.f32 %v418_v9, %v418_v9  ;;  %v517_v58 = vpop.permute.xlu0 %516 }
 0x107   : > { %v417_v16 = vsub.f32 %v386_v13, %v412_v1  ;;  %v421_v17 = vmul.f32 %v413_v14, %v413_v14  ;;  %v427_v31 = vmul.f32 %v419_v11, %v419_v11  ;;  %v428_v34 = vmul.f32 %v420_v12, %v420_v12 }
 0x108   : > { %v431_v19 = vsel %vm429_vm2, %v422_v15, 0.0  ;;  %v433_v25 = vsel %vm429_vm2, %v423_v18, 0.0  ;;  %v435_v28 = vsel %vm429_vm2, %v424_v21, 0.0  ;;  %v439_v35 = vsel %vm429_vm2, %v426_v27, 0.0 }
 0x109   : > { %v430_v22 = vsel %vm429_vm2, %v421_v17, 0.0  ;;  %v425_v24 = vmul.f32 %v417_v16, %v417_v16  ;;  %v441_v37 = vsel %vm429_vm2, %v427_v31, 0.0  ;;  %v443_v40 = vsel %vm429_vm2, %v428_v34, 0.0  ;;  %v485_v46 = vpop.permute.xlu1 %484 }
 0x10a   : > { %v432_v23 = vadd.f32 %v431_v19, %v430_v22  ;;  %v525_v60 = vpop.permute.xlu0 %524 }
 0x10b   : > { %v437_v30 = vsel %vm429_vm2, %v425_v24, 0.0 }
 0x10c   : > { %v434_v26 = vadd.f32 %v433_v25, %v432_v23 }
 0x10d   : > { %v493_v51 = vpop.permute.xlu1 %492 }
 0x10e   : > { %v436_v29 = vadd.f32 %v435_v28, %v434_v26 }
 0x110   : > { %v438_v33 = vadd.f32 %v437_v30, %v436_v29 }
 0x111   : > { %v509_v54 = vpop.permute.xlu1 %508 }
 0x112   : > { %v440_v36 = vadd.f32 %v439_v35, %v438_v33 }
 0x114   : > { %v442_v39 = vadd.f32 %v441_v37, %v440_v36 }
 0x115   : > { %v513_v57 = vpop.permute.xlu1 %512 }
 0x116   : > { %v444_v42 = vadd.f32 %v443_v40, %v442_v39 }
 0x118   : > { %v445_v43 = vrot.slane %v444_v42, 4 }
 0x119   : > { %v521_v59 = vpop.permute.xlu1 %520 }
 0x11a   : > { %v446_v45 = vadd.f32 %v445_v43, %v444_v42 }
 0x11c   : > { %v447_v47 = vrot.slane %v446_v45, 2 }
 0x11e   : > { %v448_v48 = vadd.f32 %v447_v47, %v446_v45 }
 0x120   : > { %v449_v50 = vrot.slane %v448_v48, 1 }
 0x122   : > { %v450_v52 = vadd.f32 %v449_v50, %v448_v48 }
 0x124   : > { %v452_v53 = vmul.f32 0.015625, %v450_v52 }
 0x126   : > { %v453_v56 = vadd.f32 1e-06, %v452_v53 }
 0x128   : > { %760 = vrsqrt.f32 %v453_v56 }
 0x132   : > { %v761_v61 = vpop.eup %760 }
 0x133   : > { %v455_v62 = vmul.f32 %v761_v61, %v413_v14  ;;  %v457_v63 = vmul.f32 %v761_v61, %v415_v7  ;;  %v458_v0 = vmul.f32 %v761_v61, %v416_v8  ;;  %v460_v1 = vmul.f32 %v761_v61, %v418_v9 }
 0x134   : > { %v456_v2 = vmul.f32 %v761_v61, %v414_v6  ;;  %v462_v3 = vmul.f32 %v761_v61, %v420_v12  ;;  %v459_v4 = vmul.f32 %v761_v61, %v417_v16  ;;  %v461_v5 = vmul.f32 %v761_v61, %v419_v11  ;;  %v529_v6 = vpop.permute.xlu1 %528  ;;  %v533_v12 = vpop.permute.xlu0 %532 }
 0x135   : > { %v495_v10 = vmul.f32 %v465_v20, %v455_v62  ;;  %v497_v13 = vmul.f32 %v473_v32, %v457_v63  ;;  %v498_v15 = vmul.f32 %v477_v41, %v458_v0  ;;  %v500_v17 = vmul.f32 %v485_v46, %v460_v1 }
 0x136   : > { %v496_v18 = vmul.f32 %v469_v38, %v456_v2  ;;  %v502_v19 = vmul.f32 %v493_v51, %v462_v3  ;;  %v499_v21 = vmul.f32 %v481_v44, %v459_v4  ;;  %v501_v22 = vmul.f32 %v489_v49, %v461_v5 }
 0x137   : > { %v535_v14 = vadd.f32 %v505_v55, %v495_v10  ;;  %v537_v7 = vadd.f32 %v513_v57, %v497_v13  ;;  %v538_v8 = vadd.f32 %v517_v58, %v498_v15  ;;  %v540_v9 = vadd.f32 %v525_v60, %v500_v17 }
 0x138   : > { %v536_v16 = vadd.f32 %v509_v54, %v496_v18  ;;  %v539_v11 = vadd.f32 %v521_v59, %v499_v21  ;;  %v541_v20 = vadd.f32 %v529_v6, %v501_v22  ;;  %v542_v23 = vadd.f32 %v533_v12, %v502_v19 }
 0x139   : > { %543 = vst.msk [vmem:[%s201_s9] sm:$0xff] %vm429_vm2, %v535_v14  ;;  %545 = vst.msk [vmem:[%s201_s9 + $0x10] sm:$0xff] %vm429_vm2, %v537_v7 }
 0x13a   : > { %546 = vst.msk [vmem:[%s201_s9 + $0x18] sm:$0xff] %vm429_vm2, %v538_v8  ;;  %548 = vst.msk [vmem:[%s201_s9 + $0x28] sm:$0xff] %vm429_vm2, %v540_v9 }
 0x13b   : > { %544 = vst.msk [vmem:[%s201_s9 + $0x8] sm:$0xff] %vm429_vm2, %v536_v16  ;;  %547 = vst.msk [vmem:[%s201_s9 + $0x20] sm:$0xff] %vm429_vm2, %v539_v11 }
 0x13c   : > { %549 = vst.msk [vmem:[%s201_s9 + $0x30] sm:$0xff] %vm429_vm2, %v541_v20  ;;  %550 = vst.msk [vmem:[%s201_s9 + $0x38] sm:$0xff] %vm429_vm2, %v542_v23 }
 0x13d PF: > { %s13_s14 = sadd.s32 1, %s784_s14   ;;  %s975_s12 = smov %s780_s13 }
 0x13e   : > { %p10_p5 = scmp.ge.s32.totalorder %s13_s14, 4   ;;  %s976_s13 = smov %s978_s15 }
 0x140   :  { %12 = sbr.rel (!%p10_p5) target bundleno = 2 (0x2), region = 62 }

</bundles_post_ra>
